<compile_context>
chip_gen: v7x
topology: tpu7x:2x2x1
jax: 0.10.0
libtpu: 0.0.40
codegen_flags: <defaults>
</compile_context>

<pallas_src>
import jax
import jax.numpy as jnp
from jax import lax
from jax.experimental import pallas as pl
from jax.experimental.pallas import tpu as pltpu


_TARGET_BLOCK_BYTES = 6 * 1024 * 1024    # HBM->VMEM DMA block size (input dtype)
_CHUNK_BYTES = 768 * 1024                # in-kernel f32 working set per chunk
_VMEM_LIMIT_BYTES = 32 * 1024 * 1024     # raises v5e's 16 MiB scoped default
_NUM_PARTS = 2                           # leading "parallel" axis (2 TCs on v7x)
_MIN_PALLAS_ELEMENTS = 128 * 1024        # below this, plain XLA is faster


def _round_down(x: int, m: int) -> int:
    return (x // m) * m


def _round_up(x: int, m: int) -> int:
    return ((x + m - 1) // m) * m


def _row_tiling(n_rows, n_cols, itemsize, target_block_bytes, chunk_bytes):
    """Returns (block_rows, chunk_rows); block_rows % chunk_rows == 0 and
    chunk_rows % 8 == 0, unless the whole factor fits one full-dim block."""
    chunk = max(8, _round_down(chunk_bytes // (n_cols * 4), 8))
    if n_rows <= chunk:
        # One block covering the full factor (full-dim block shapes are legal
        # regardless of (8, 128) divisibility), no chunking needed.
        return n_rows, n_rows
    block = _round_down(max(target_block_bytes // (n_cols * itemsize), chunk), chunk)
    block = min(block, _round_up(n_rows, chunk))
    return block, chunk


def _make_sumsq_kernel(total_rows, block_rows, chunk_rows, kpp, needs_mask):
    """sum(x**2) over row blocks of one factor; grid = (part, k)."""
    n_chunks = block_rows // chunk_rows

    def kernel(x_ref, o_ref, acc_ref):
        p = pl.program_id(0)
        k = pl.program_id(1)

        @pl.when(k == 0)
        def _init():
            acc_ref[...] = jnp.zeros_like(acc_ref)

        row0 = (p * kpp + k) * block_rows          # first global row of this block
        rid = (lax.broadcasted_iota(jnp.int32, (chunk_rows, 1), 0)
               if needs_mask else None)

        def accum(chunk_row0, x):
            x = x.astype(jnp.float32)
            x2 = x * x
            if needs_mask:
                # Rows at/after `total_rows` are ragged-tail / phantom padding;
                # select exact zeros for them (handles unspecified block padding).
                x2 = jnp.where(rid < (total_rows - chunk_row0), x2, 0.0)
            acc_ref[...] += x2

        if n_chunks == 1:
            accum(row0, x_ref[...])
        else:
            def body(c, carry):
                start = pl.multiple_of(c * chunk_rows, 8)
                accum(row0 + start, x_ref[pl.ds(start, chunk_rows), :])
                return carry
            lax.fori_loop(0, n_chunks, body, 0, unroll=True)

        @pl.when(k == kpp - 1)
        def _finalize():
            # Lane/sublane-dense (8, 128) output tile, broadcast of the scalar.
            o_ref[...] = jnp.full(o_ref.shape, jnp.sum(acc_ref[...]), jnp.float32)

    return kernel


def _factor_sum_of_squares(x, *, target_block_bytes=_TARGET_BLOCK_BYTES,
                           chunk_bytes=_CHUNK_BYTES):
    """sum(|x|**2) of a single [rows, cols] factor, streamed from HBM in place."""
    n_rows, n_cols = x.shape
    if n_rows == 0 or n_cols == 0:
        return jnp.float32(0.0)
    itemsize = jnp.dtype(x.dtype).itemsize
    if n_cols * 8 * 4 > target_block_bytes:
        # TODO(synk): rank so wide that even an 8-row block exceeds the VMEM
        # block budget; fall back to plain XLA rather than tiling the lane dim.
        return jnp.sum(jnp.square(x.astype(jnp.float32)))

    block_rows, chunk_rows = _row_tiling(n_rows, n_cols, itemsize,
                                         target_block_bytes, chunk_bytes)
    n_blocks = pl.cdiv(n_rows, block_rows)
    num_parts = min(_NUM_PARTS, n_blocks)
    kpp = pl.cdiv(n_blocks, num_parts)               # reduction steps per part
    needs_mask = (num_parts * kpp * block_rows) != n_rows

    kernel = _make_sumsq_kernel(n_rows, block_rows, chunk_rows, kpp, needs_mask)

    # Block index for (part p, step k); phantom steps (only possible when
    # needs_mask is True) are clamped onto the last real block and fully masked.
    def in_index(p, k):
        return (jnp.minimum(p * kpp + k, n_blocks - 1), 0)

    pipeline_mode = pl.Buffered(3) if num_parts * kpp >= 3 else None

    partials = pl.pallas_call(
        kernel,
        out_shape=jax.ShapeDtypeStruct((num_parts * 8, 128), jnp.float32),
        grid=(num_parts, kpp),
        in_specs=[pl.BlockSpec((block_rows, n_cols), in_index,
                               pipeline_mode=pipeline_mode)],
        out_specs=pl.BlockSpec((8, 128), lambda p, k: (p, 0)),
        scratch_shapes=[pltpu.VMEM((chunk_rows, n_cols), jnp.float32)],
        compiler_params=pltpu.CompilerParams(
            dimension_semantics=("parallel", "arbitrary"),
            vmem_limit_bytes=_VMEM_LIMIT_BYTES),
    )(x)
    # Each part's partial sum is replicated over its (8, 128) tile; pick one
    # representative per part and combine.
    return jnp.sum(partials.reshape(num_parts, 8, 128)[:, 0, 0])


def l2_regularizer(factors, weight, *, min_pallas_elements=_MIN_PALLAS_ELEMENTS,
                   target_block_bytes=_TARGET_BLOCK_BYTES,
                   chunk_bytes=_CHUNK_BYTES):
    """Pallas-backed equivalent of L2(weight).forward(factors) (real factors)."""
    factors = tuple(factors)
    assert all(f.ndim == 2 for f in factors), "factors are expected to be [batch, rank]"
    rank = factors[0].shape[1]           # == factors[0][0].shape[0] in the PyTorch code
    total = jnp.float32(0.0)
    for f in factors:
        if f.size < min_pallas_elements:
            # Tiny factor: kernel-launch overhead dominates, use plain XLA.
            total = total + jnp.sum(jnp.abs(f.astype(jnp.float32)) ** 2)
        else:
            total = total + _factor_sum_of_squares(
                f, target_block_bytes=target_block_bytes, chunk_bytes=chunk_bytes)
    return (jnp.float32(weight) * total) / jnp.float32(rank)


def _reference(factors, weight):
    norm = jnp.float32(0.0)
    for factor in factors:
        norm = norm + jnp.float32(weight) * jnp.sum(
            jnp.abs(factor.astype(jnp.float32)) ** 2)
    return norm / jnp.float32(factors[0].shape[1])


if __name__ == "__main__":
    key = jax.random.PRNGKey(0)
    weight = 0.05
    ks = jax.random.split(key, 8)

    def check(name, factors, rtol=1e-5, **kwargs):
        out = jax.block_until_ready(l2_regularizer(factors, weight, **kwargs))
        ref = jax.block_until_ready(_reference(factors, weight))
        assert jnp.allclose(out, ref, rtol=rtol, atol=1e-5), (name, out, ref)

    # 1) Small aligned factors (lhs / rel / rhs embedding factors), Pallas forced.
    factors_a = tuple(jax.random.normal(ks[i], (8, 32), jnp.float32) for i in range(3))
    check("aligned_small_pallas", factors_a, min_pallas_elements=0)
    #    ... and the small-input XLA fallback path (default threshold).
    check("aligned_small_fallback", factors_a)

    # 2) Odd, non-tile-aligned factors: full-dim single block, no padding copies.
    factors_b = tuple(jax.random.normal(ks[3 + i], (37, 30), jnp.float32)
                      for i in range(3))
    check("ragged_small_pallas", factors_b, min_pallas_elements=0)

    # 3) Multi-block factors, mixed f32 / bf16.
    factors_c = (jax.random.normal(ks[6], (3000, 96), jnp.float32),
                 jax.random.normal(ks[7], (3000, 96), jnp.float32).astype(jnp.bfloat16))
    #    a) Default tiling: single partial block per factor, chunked + row-masked.
    check("multi_chunk_default", factors_c, rtol=1e-4)
    #    b) Small tile override: exercises the 2-part "parallel" split, multi-step
    #       accumulation (kpp > 1), phantom-block clamping and 3-deep buffering.
    check("multi_block_small_tiles", factors_c, rtol=1e-4,
          min_pallas_elements=0, target_block_bytes=256 * 1024,
          chunk_bytes=64 * 1024)

    print("KERNEL_OK")
</pallas_src>

<mosaic_0001>
module attributes {stable_mosaic.version = 11 : i64} {
  func.func @kernel(%arg0: i32, %arg1: i32, %arg2: memref<8x32xf32, #tpu.memory_space<vmem>>, %arg3: memref<8x128xf32, #tpu.memory_space<vmem>>, %arg4: memref<8x32xf32, #tpu.memory_space<vmem>>) attributes {dimension_semantics = [#tpu.dimension_semantics<parallel>, #tpu.dimension_semantics<arbitrary>], iteration_bounds = array<i64: 1, 1>, scalar_prefetch = 0 : i64, scratch_operands = 1 : i64, tpu.core_type = #tpu.core_type<tc>, window_params = [{transform_indices = @transform_0, window_bounds = array<i64: 8, 32>}, {transform_indices = @transform_1, window_bounds = array<i64: 8, 128>}]} {
    %c0_i32 = arith.constant 0 : i32
    %0 = arith.cmpi eq, %arg1, %c0_i32 : i32
    %1 = arith.extui %0 : i1 to i32
    %c0_i32_0 = arith.constant 0 : i32
    %2 = arith.cmpi ne, %1, %c0_i32_0 : i32
    scf.if %2 {
      %cst = arith.constant 0.000000e+00 : f32
      %11 = vector.broadcast %cst : f32 to vector<8x32xf32>
      %c0_8 = arith.constant 0 : index
      %c0_9 = arith.constant 0 : index
      %12 = vector.load %arg4[%c0_8, %c0_9] : memref<8x32xf32, #tpu.memory_space<vmem>>, vector<8x32xf32>
      tpu.vector_store %arg4[%c0_8, %c0_9], %11 {strides = array<i32>} : memref<8x32xf32, #tpu.memory_space<vmem>>, vector<8x32xf32>,
    } else {
    }
    %c0 = arith.constant 0 : index
    %c0_1 = arith.constant 0 : index
    %3 = vector.load %arg2[%c0, %c0_1] : memref<8x32xf32, #tpu.memory_space<vmem>>, vector<8x32xf32>
    %4 = arith.mulf %3, %3 : vector<8x32xf32>
    %c0_2 = arith.constant 0 : index
    %c0_3 = arith.constant 0 : index
    %5 = vector.load %arg4[%c0_2, %c0_3] : memref<8x32xf32, #tpu.memory_space<vmem>>, vector<8x32xf32>
    %6 = arith.addf %5, %4 : vector<8x32xf32>
    %c0_4 = arith.constant 0 : index
    %c0_5 = arith.constant 0 : index
    %7 = vector.load %arg4[%c0_4, %c0_5] : memref<8x32xf32, #tpu.memory_space<vmem>>, vector<8x32xf32>
    tpu.vector_store %arg4[%c0_4, %c0_5], %6 {strides = array<i32>} : memref<8x32xf32, #tpu.memory_space<vmem>>, vector<8x32xf32>,
    %c0_i32_6 = arith.constant 0 : i32
    %8 = arith.cmpi eq, %arg1, %c0_i32_6 : i32
    %9 = arith.extui %8 : i1 to i32
    %c0_i32_7 = arith.constant 0 : i32
    %10 = arith.cmpi ne, %9, %c0_i32_7 : i32
    scf.if %10 {
      %c0_8 = arith.constant 0 : index
      %c0_9 = arith.constant 0 : index
      %11 = vector.load %arg4[%c0_8, %c0_9] : memref<8x32xf32, #tpu.memory_space<vmem>>, vector<8x32xf32>
      %12 = vector.shape_cast %11 : vector<8x32xf32> to vector<1x8x32xf32>
      %cst = arith.constant dense<0.000000e+00> : vector<1xf32>
      %13 = vector.multi_reduction <add>, %12, %cst [1, 2] : vector<1x8x32xf32> to vector<1xf32>
      %14 = vector.shape_cast %13 : vector<1xf32> to vector<1x1x1xf32>
      %15 = vector.extract %14[0, 0, 0] : f32 from vector<1x1x1xf32>
      %16 = vector.broadcast %15 : f32 to vector<8x128xf32>
      %c0_10 = arith.constant 0 : index
      %c0_11 = arith.constant 0 : index
      %17 = vector.load %arg3[%c0_10, %c0_11] : memref<8x128xf32, #tpu.memory_space<vmem>>, vector<8x128xf32>
      tpu.vector_store %arg3[%c0_10, %c0_11], %16 {strides = array<i32>} : memref<8x128xf32, #tpu.memory_space<vmem>>, vector<8x128xf32>,
    } else {
    }
    return
  }
  func.func @transform_0(%arg0: i32, %arg1: i32) -> (i32, i32) {
    %c1_i32 = arith.constant 1 : i32
    %0 = arith.muli %arg0, %c1_i32 : i32
    %1 = arith.addi %0, %arg1 : i32
    %c0_i32 = arith.constant 0 : i32
    %2 = arith.minsi %1, %c0_i32 : i32
    %c0_i32_0 = arith.constant 0 : i32
    %c0_i32_1 = arith.constant 0 : i32
    return %2, %c0_i32_0 : i32, i32
  }
  func.func @transform_1(%arg0: i32, %arg1: i32) -> (i32, i32) {
    %c0_i32 = arith.constant 0 : i32
    %c0_i32_0 = arith.constant 0 : i32
    return %arg0, %c0_i32 : i32, i32
  }
}

</mosaic_0001>

<bundles_post_ra>
// kernel: tpu_custom_call.1
= control target key start
LH: loop header
LB: loop body
LE: loop exit
PB: predicated region body
PF: predicated region fallthrough
CT: control target
= control target key end

     0   :  { %6 = vsyncpa [#allocation4], 0  ;;  %s164_s0 = inlined_call_operand.hbm [shape: f32[8,32], index: 0, kind: input, shape index: {}]   ;;  %s165_s1 = inlined_call_operand.hbm [shape: f32[8,128], index: 1, kind: output, shape index: {}]  }
   0x1   :  { %7 = vsyncpa [#allocation5], 0  ;;  %s127_s6 = smov [#allocation3]   ;;  %s79_s10 = scalar_lea.hbm %s164_s0, 128 }
   0x2   :  { %s19_s7 = sshll.u32 %s127_s6, 4  ;;  %p80_p0 = scmp.ne.s32.totalorder %s164_s0, %s79_s10  ;;  %s20_s7 = int_to_ptr.vmem [resolvable:$true] %s19_s7 }
   0x3   :  { %p83_p1 = scmp.lt.u32.totalorder %s79_s10, %s164_s0 }
   0x5   :  { %p85_p2 = pnand %p83_p1, %p80_p0 }
   0x7   :  { %88 = shalt.err (!%p85_p2)
}
   0x8   :  { %s89_s15 = scalar_lea.vmem %s20_s7, 128  ;;  %p94_p4 = scmp.lt.s32.totalorder %s20_s7, %s20_s7 }
   0x9   :  { %p90_p3 = scmp.ne.s32.totalorder %s20_s7, %s89_s15  ;;  %p95_p5 = scmp.lt.s32.totalorder %s89_s15, %s89_s15 }
   0xb   :  { %p96_p6 = por %p95_p5, %p94_p4 }
   0xd   :  { %p97_p7 = pnand %p96_p6, %p90_p3 }
   0xf   :  { %100 = shalt.err (!%p97_p7)
}
  0x10   :  { %22 = dma.hbm_to_vmem [thread:$0]  %s164_s0, 128, %s20_s7, [#allocation4]  }
  0x11   :  { %123 = dma.done.wait [#allocation4], 128  }
  0x12   :  { %124 = vsyncadd [#allocation4], 4294967168  ;;  %vm33_vm0 = vcmask 261120   ;;  %v128_v0 = vmov 0.0   ;;  %v35_v1 = vld [vmem:[#allocation3] sm:$0xff]  ;;  %s129_s0 = smov [#allocation6]  }
  0x13   :  { %34 = vst.msk [vmem:[#allocation2] sm:$0xff] %vm33_vm0, %v128_v0  ;;  %v36_v2 = vmul.f32 %v35_v1, %v35_v1  ;;  %s63_s18 = sshll.u32 %s129_s0, 4  ;;  %s64_s18 = int_to_ptr.vmem [resolvable:$true] %s63_s18 }
  0x14   :  { %s101_s20 = scalar_lea.vmem %s64_s18, 128  ;;  %p106_p9 = scmp.lt.s32.totalorder %s64_s18, %s64_s18 }
  0x15   :  { %p102_p8 = scmp.ne.s32.totalorder %s64_s18, %s101_s20  ;;  %p107_p10 = scmp.lt.s32.totalorder %s101_s20, %s101_s20 }
  0x17   :  { %p108_p11 = por %p107_p10, %p106_p9 }
  0x19   :  { %p109_p12 = pnand %p108_p11, %p102_p8 }
  0x1a   :  { %v37_v3 = vld [vmem:[#allocation2] sm:$0xff] }
  0x1b   :  { %v38_v4 = vadd.f32 %v37_v3, %v36_v2 }
  0x1d   :  { %40 = vst.msk [vmem:[#allocation2] sm:$0xff] %vm33_vm0, %v38_v4 }
  0x24   :  { %v44_v5 = vld [vmem:[#allocation2] sm:$0xff] }
  0x25   :  { %v45_v6 = vsel %vm33_vm0, %v44_v5, 0.0 }
  0x26   :  { %46 = vadd.xlane.f32.xlu0 %v45_v6 }
  0xb3   :  { %v47_v7 = vpop.xlane.xlu0 %46 }
  0xb4   :  { %v48_v8 = vrot.slane %v47_v7, 4 }
  0xb6   :  { %v49_v9 = vadd.f32 %v48_v8, %v47_v7 }
  0xb8   :  { %v50_v10 = vrot.slane %v49_v9, 2 }
  0xba   :  { %v51_v11 = vadd.f32 %v50_v10, %v49_v9 }
  0xbc   :  { %v52_v12 = vrot.slane %v51_v11, 1 }
  0xbe   :  { %v53_v13 = vadd.f32 %v52_v12, %v51_v11 }
  0xc0   :  { %74 = vpush %v53_v13 }
  0xf1   :  { %s75_s19 = spop %74 }
  0xf2   :  { %v55_v14 = vstv %s75_s19 }
  0xf3   :  { %56 = vst [vmem:[#allocation6] sm:$0xff] %v55_v14 }
  0xf4   :  { %112 = shalt.err (!%p109_p12)
}
  0xf5   :  { %s113_s23 = scalar_lea.hbm %s165_s1, 128 }
  0xf6   :  { %p114_p13 = scmp.ne.s32.totalorder %s165_s1, %s113_s23  ;;  %p117_p0 = scmp.lt.u32.totalorder %s113_s23, %s165_s1 }
  0xf8   :  { %p119_p1 = pnand %p117_p0, %p114_p13 }
  0xfa   :  { %122 = shalt.err (!%p119_p1)
}
  0xfb   :  { %66 = dma.vmem_to_hbm [thread:$0]  %s64_s18, 128, %s165_s1, [#allocation5]  }
  0xfc   :  { %125 = dma.done.wait [#allocation5], 128  }
  0xfd   :  { %126 = vsyncadd [#allocation5], 4294967168 }
  0xfe   :  { %70 = vsyncpa [#allocation4], 1 }
  0xff   :  { %71 = vsyncpa [#allocation5], 1 }

</bundles_post_ra>
